<compile_context>
chip_gen: v5e
topology: v5e:2x2
jax: 0.10.0
libtpu: 0.0.40
codegen_flags: <defaults>
</compile_context>

<pallas_src>
import jax
import jax.numpy as jnp
from jax import lax
from jax.experimental import pallas as pl
from jax.experimental.pallas import tpu as pltpu

LN_EPS = 1e-5  # torch.nn.LayerNorm default


def _round_up(x, m):
    return ((x + m - 1) // m) * m


def _sublane(dtype) -> int:
    # Native sublane packing per element width (f32: 8, bf16: 16, int8/fp8: 32).
    return {1: 32, 2: 16, 4: 8}.get(jnp.dtype(dtype).itemsize, 8)


def _vmem_capacity_bytes() -> int:
    try:
        info = pltpu.get_tpu_info()
        cap = getattr(info, "vmem_capacity_bytes", None)
        if cap:
            return int(cap)
    except Exception:
        pass
    return 64 << 20  # conservative default (v7x-sized part)


def _prenorm_linear_kernel(x_ref, g_ref, b_ref, w_ref, bias_ref, o_ref, y_ref):
    # Grid: (row_tiles, h_tiles). LayerNorm is computed once per row tile
    # (at j == 0) into the VMEM scratch y_ref (already in the MXU operand
    # dtype) and reused across H tiles.  This requires the H axis to be the
    # innermost, sequentially executed ("arbitrary") grid axis.
    @pl.when(pl.program_id(1) == 0)
    def _():
        x = x_ref[...].astype(jnp.float32)
        mean = jnp.mean(x, axis=-1, keepdims=True)
        ex2 = jnp.mean(x * x, axis=-1, keepdims=True)
        var = jnp.maximum(ex2 - mean * mean, 0.0)       # single-pass variance
        xhat = (x - mean) * lax.rsqrt(var + LN_EPS)     # EUP rsqrt
        # gamma/beta arrive as f32 (cast hoisted into the wrapper); store the
        # LN result directly in the MXU operand dtype.
        y_ref[...] = (xhat * g_ref[...] + b_ref[...]).astype(y_ref.dtype)

    # fn == Linear(D, H tile): MXU operands at the weight's native dtype
    # (bf16 in real MAE/ViT) with f32 accumulation.
    acc = jnp.dot(y_ref[...], w_ref[...], preferred_element_type=jnp.float32)
    o_ref[...] = (acc + bias_ref[...]).astype(o_ref.dtype)


def _prenorm_linear_recompute_kernel(x_ref, g_ref, b_ref, w_ref, bias_ref, o_ref):
    # Variant with no cross-j scratch: LN recomputed per H tile so the H axis
    # may be megacore-parallel (used when there is only one row tile).
    x = x_ref[...].astype(jnp.float32)
    mean = jnp.mean(x, axis=-1, keepdims=True)
    ex2 = jnp.mean(x * x, axis=-1, keepdims=True)
    var = jnp.maximum(ex2 - mean * mean, 0.0)
    y = ((x - mean) * lax.rsqrt(var + LN_EPS)) * g_ref[...] + b_ref[...]
    acc = jnp.dot(y.astype(w_ref.dtype), w_ref[...],
                  preferred_element_type=jnp.float32)
    o_ref[...] = (acc + bias_ref[...]).astype(o_ref.dtype)


def prenorm_linear(x, gamma, beta, w, bias, *, block_rows=None, block_h=None):
    """fn(LayerNorm(x)) with fn = Linear, fused in a single Pallas kernel.

    x:     (B, N, D)
    gamma: (D,)   beta: (D,)        -- LayerNorm affine params
    w:     (D, H) bias: (H,)        -- Linear params ((in, out) layout)
    returns (B, N, H)
    """
    B, N, D = x.shape
    H = w.shape[1]
    rows = B * N

    x_b = jnp.dtype(x.dtype).itemsize
    w_b = jnp.dtype(w.dtype).itemsize
    o_b = x_b
    scratch_b = w_b  # LN scratch stored in the MXU operand dtype
    sub = max(_sublane(x.dtype), _sublane(w.dtype))

    # ---- Per-generation VMEM budget for tile selection.
    cap = _vmem_capacity_bytes()
    if cap <= (64 << 20):                    # v7x: 64 MiB per TC, leave headroom
        budget = min(48 << 20, cap - (12 << 20))
    else:                                    # v5e / v6e: 128 MiB
        budget = min(96 << 20, cap - (16 << 20))
    budget = max(budget, 24 << 20)

    # ---- H (lane) tiling: 256-aligned for the 2x256x256 MXUs on v6e/v7x.
    H_p = 128 if H <= 128 else _round_up(H, 256)
    if block_h is not None:
        tn = block_h
        assert tn % 128 == 0 and H_p % tn == 0, "block_h must tile the padded H"
    elif 2 * D * H_p * w_b <= budget // 2:
        tn = H_p        # whole W resident -> fetched from HBM exactly once
    else:
        tn = 128
        for cand in (2048, 1024, 512, 256):
            if H_p % cand == 0 and 2 * D * cand * w_b <= budget // 3:
                tn = cand
                break

    # ---- Row tile: as big as the VMEM budget allows (amortizes grid-step
    #      overhead and W re-reads), rounded to the dtype sublane multiple.
    per_row = 2 * D * x_b + 2 * tn * o_b + D * scratch_b
    fixed = 2 * D * tn * w_b + 4 * D * 4 + 2 * tn * 4     # W tiles + gamma/beta/bias
    if block_rows is not None:
        tm = max(sub, _round_up(block_rows, sub))
    else:
        tm = max(budget - fixed, per_row) // per_row
        tm = int(min(tm, 2048, _round_up(rows, sub)))
        tm = max(sub, (tm // sub) * sub)
        # Megacore balance: prefer >= 2 row tiles so both TensorCores get work.
        if (rows + tm - 1) // tm < 2 and rows > sub:
            tm = max(sub, _round_up((rows + 1) // 2, sub))
    rows_p = _round_up(rows, tm)

    row_tiles = rows_p // tm
    h_tiles = H_p // tn
    grid = (row_tiles, h_tiles)

    # ---- Pad ragged rows / lanes in the wrapper (zero rows & columns are
    #      harmless and sliced off afterwards).
    x2 = x.reshape(rows, D)
    if rows_p != rows:
        x2 = jnp.pad(x2, ((0, rows_p - rows), (0, 0)))
    w_p = w if H_p == H else jnp.pad(w, ((0, 0), (0, H_p - H)))
    bias_p = bias if H_p == H else jnp.pad(bias, (0, H_p - H))

    # Grid-invariant params: cast once here, resident blocks in VMEM.
    g2 = gamma.astype(jnp.float32).reshape(1, D)
    be2 = beta.astype(jnp.float32).reshape(1, D)
    bi2 = bias_p.astype(jnp.float32).reshape(1, H_p)

    # ---- Kernel / semantics selection.
    if row_tiles == 1 and h_tiles > 1:
        # Only one row tile: recompute LN per H tile so the H axis can shard
        # across TensorCores instead of leaving one idle.
        kernel = _prenorm_linear_recompute_kernel
        scratch_shapes = []
        dim_sem = ("arbitrary", "parallel")
    else:
        # LN-scratch reuse requires the H axis to stay sequential ("arbitrary").
        kernel = _prenorm_linear_kernel
        scratch_shapes = [pltpu.VMEM((tm, D), w.dtype)]
        dim_sem = ("parallel", "arbitrary")

    # ---- VMEM limit: real estimate (+ margin), capped below physical capacity.
    vmem_est = (2 * tm * D * x_b          # double-buffered x tile
                + 2 * D * tn * w_b        # double-buffered W tile
                + 2 * tm * tn * o_b       # double-buffered out tile
                + tm * D * scratch_b      # LN scratch (w.dtype)
                + 4 * D * 4 + 2 * tn * 4)  # gamma/beta/bias
    headroom = (8 << 20) if cap <= (64 << 20) else (16 << 20)
    vmem_limit = int(min(max(vmem_est + (4 << 20), 32 << 20), cap - headroom))

    # ---- Cost hint with the real W re-read factor.
    w_reads = row_tiles if h_tiles > 1 else 1
    cost = pl.CostEstimate(
        flops=2 * rows_p * D * H_p + 8 * rows_p * D,
        transcendentals=rows_p,
        bytes_accessed=(rows_p * D * x_b
                        + w_reads * D * H_p * w_b
                        + rows_p * H_p * o_b),
    )

    out2 = pl.pallas_call(
        kernel,
        out_shape=jax.ShapeDtypeStruct((rows_p, H_p), x.dtype),
        grid_spec=pltpu.PrefetchScalarGridSpec(
            num_scalar_prefetch=0,
            grid=grid,
            in_specs=[
                pl.BlockSpec((tm, D), lambda i, j: (i, 0)),   # x tile
                pl.BlockSpec((1, D), lambda i, j: (0, 0)),    # gamma (f32)
                pl.BlockSpec((1, D), lambda i, j: (0, 0)),    # beta  (f32)
                pl.BlockSpec((D, tn), lambda i, j: (0, j)),   # W tile (native dtype)
                pl.BlockSpec((1, tn), lambda i, j: (0, j)),   # bias tile (f32)
            ],
            out_specs=pl.BlockSpec((tm, tn), lambda i, j: (i, j)),
            scratch_shapes=scratch_shapes,
        ),
        compiler_params=pltpu.CompilerParams(
            dimension_semantics=dim_sem,
            vmem_limit_bytes=vmem_limit,
        ),
        cost_estimate=cost,
    )(x2, g2, be2, w_p, bi2)

    return out2[:rows, :H].reshape(B, N, H)


def _reference(x, gamma, beta, w, bias):
    xf = x.astype(jnp.float32)
    mean = jnp.mean(xf, axis=-1, keepdims=True)
    var = jnp.mean((xf - mean) ** 2, axis=-1, keepdims=True)
    xhat = (xf - mean) / jnp.sqrt(var + LN_EPS)
    y = xhat * gamma.astype(jnp.float32) + beta.astype(jnp.float32)
    return (y @ w.astype(jnp.float32) + bias.astype(jnp.float32)).astype(x.dtype)


if __name__ == "__main__":
    # TODO(synk): `fn` in PreNorm is an arbitrary module; here it is instantiated
    # as a deterministic Linear(dim, hidden) for the synthetic forward pass.
    B, N, D, H = 2, 8, 32, 64
    key = jax.random.PRNGKey(0)
    kx, kw, kb = jax.random.split(key, 3)

    x = jax.random.normal(kx, (B, N, D), dtype=jnp.float32)
    gamma = jnp.ones((D,), dtype=jnp.float32)   # torch LayerNorm init
    beta = jnp.zeros((D,), dtype=jnp.float32)
    w = jax.random.normal(kw, (D, H), dtype=jnp.float32) * 0.02
    bias = jax.random.normal(kb, (H,), dtype=jnp.float32) * 0.02

    out = prenorm_linear(x, gamma, beta, w, bias)
    out = jax.block_until_ready(out)

    ref = _reference(x, gamma, beta, w, bias)
    assert out.shape == (B, N, H)
    assert jnp.allclose(out, ref, atol=1e-4, rtol=1e-4), "mismatch vs reference"

    print("KERNEL_OK")
</pallas_src>

<mosaic_0001>
module attributes {stable_mosaic.version = 11 : i64} {
  func.func @_prenorm_linear_kernel(%arg0: i32, %arg1: i32, %arg2: memref<8x32xf32, #tpu.memory_space<vmem>>, %arg3: memref<1x32xf32, #tpu.memory_space<vmem>>, %arg4: memref<1x32xf32, #tpu.memory_space<vmem>>, %arg5: memref<32x128xf32, #tpu.memory_space<vmem>>, %arg6: memref<1x128xf32, #tpu.memory_space<vmem>>, %arg7: memref<8x128xf32, #tpu.memory_space<vmem>>, %arg8: memref<8x32xf32, #tpu.memory_space<vmem>>) attributes {dimension_semantics = [#tpu.dimension_semantics<parallel>, #tpu.dimension_semantics<arbitrary>], iteration_bounds = array<i64: 2, 1>, scalar_prefetch = 0 : i64, scratch_operands = 1 : i64, tpu.core_type = #tpu.core_type<tc>, window_params = [{transform_indices = @transform_0, window_bounds = array<i64: 8, 32>}, {pipeline_mode = #tpu.pipeline_mode<synchronous>, transform_indices = @transform_1, window_bounds = array<i64: 1, 32>}, {pipeline_mode = #tpu.pipeline_mode<synchronous>, transform_indices = @transform_2, window_bounds = array<i64: 1, 32>}, {transform_indices = @transform_3, window_bounds = array<i64: 32, 128>}, {transform_indices = @transform_4, window_bounds = array<i64: 1, 128>}, {transform_indices = @transform_5, window_bounds = array<i64: 8, 128>}]} {
    %c0_i32 = arith.constant 0 : i32
    %0 = arith.cmpi eq, %arg1, %c0_i32 : i32
    %1 = arith.extui %0 : i1 to i32
    %c0_i32_0 = arith.constant 0 : i32
    %2 = arith.cmpi ne, %1, %c0_i32_0 : i32
    scf.if %2 {
      %c0_8 = arith.constant 0 : index
      %c0_9 = arith.constant 0 : index
      %10 = vector.load %arg2[%c0_8, %c0_9] : memref<8x32xf32, #tpu.memory_space<vmem>>, vector<8x32xf32>
      %cst_10 = arith.constant dense<0.000000e+00> : vector<8xf32>
      %11 = vector.multi_reduction <add>, %10, %cst_10 [1] : vector<8x32xf32> to vector<8xf32>
      %12 = vector.shape_cast %11 : vector<8xf32> to vector<8x1xf32>
      %cst_11 = arith.constant 3.200000e+01 : f32
      %13 = vector.broadcast %cst_11 : f32 to vector<8x1xf32>
      %14 = arith.divf %12, %13 : vector<8x1xf32>
      %15 = arith.mulf %10, %10 : vector<8x32xf32>
      %cst_12 = arith.constant dense<0.000000e+00> : vector<8xf32>
      %16 = vector.multi_reduction <add>, %15, %cst_12 [1] : vector<8x32xf32> to vector<8xf32>
      %17 = vector.shape_cast %16 : vector<8xf32> to vector<8x1xf32>
      %cst_13 = arith.constant 3.200000e+01 : f32
      %18 = vector.broadcast %cst_13 : f32 to vector<8x1xf32>
      %19 = arith.divf %17, %18 : vector<8x1xf32>
      %20 = arith.mulf %14, %14 : vector<8x1xf32>
      %21 = arith.subf %19, %20 : vector<8x1xf32>
      %cst_14 = arith.constant 0.000000e+00 : f32
      %22 = vector.broadcast %cst_14 : f32 to vector<8x1xf32>
      %23 = arith.maximumf %21, %22 : vector<8x1xf32>
      %24 = vector.broadcast %14 : vector<8x1xf32> to vector<8x32xf32>
      %25 = arith.subf %10, %24 : vector<8x32xf32>
      %cst_15 = arith.constant 9.99999974E-6 : f32
      %26 = vector.broadcast %cst_15 : f32 to vector<8x1xf32>
      %27 = arith.addf %23, %26 : vector<8x1xf32>
      %28 = math.rsqrt %27 : vector<8x1xf32>
      %29 = vector.broadcast %28 : vector<8x1xf32> to vector<8x32xf32>
      %30 = arith.mulf %25, %29 : vector<8x32xf32>
      %c0_16 = arith.constant 0 : index
      %c0_17 = arith.constant 0 : index
      %31 = vector.load %arg3[%c0_16, %c0_17] : memref<1x32xf32, #tpu.memory_space<vmem>>, vector<1x32xf32>
      %32 = vector.broadcast %31 : vector<1x32xf32> to vector<8x32xf32>
      %33 = arith.mulf %30, %32 : vector<8x32xf32>
      %c0_18 = arith.constant 0 : index
      %c0_19 = arith.constant 0 : index
      %34 = vector.load %arg4[%c0_18, %c0_19] : memref<1x32xf32, #tpu.memory_space<vmem>>, vector<1x32xf32>
      %35 = vector.broadcast %34 : vector<1x32xf32> to vector<8x32xf32>
      %36 = arith.addf %33, %35 : vector<8x32xf32>
      %c0_20 = arith.constant 0 : index
      %c0_21 = arith.constant 0 : index
      %37 = vector.load %arg8[%c0_20, %c0_21] : memref<8x32xf32, #tpu.memory_space<vmem>>, vector<8x32xf32>
      tpu.vector_store %arg8[%c0_20, %c0_21], %36 {strides = array<i32>} : memref<8x32xf32, #tpu.memory_space<vmem>>, vector<8x32xf32>,
    } else {
    }
    %c0 = arith.constant 0 : index
    %c0_1 = arith.constant 0 : index
    %3 = vector.load %arg8[%c0, %c0_1] : memref<8x32xf32, #tpu.memory_space<vmem>>, vector<8x32xf32>
    %c0_2 = arith.constant 0 : index
    %c0_3 = arith.constant 0 : index
    %4 = vector.load %arg5[%c0_2, %c0_3] : memref<32x128xf32, #tpu.memory_space<vmem>>, vector<32x128xf32>
    %cst = arith.constant dense<0.000000e+00> : vector<8x128xf32>
    %5 = tpu.matmul %3, %4, %cst {dimension_numbers = #tpu.dot_dimension_numbers<[1], [0], [0], [1], [0, 0, 1, 1], [], []>} : vector<8x32xf32>, vector<32x128xf32>, vector<8x128xf32> -> vector<8x128xf32>
    %c0_4 = arith.constant 0 : index
    %c0_5 = arith.constant 0 : index
    %6 = vector.load %arg6[%c0_4, %c0_5] : memref<1x128xf32, #tpu.memory_space<vmem>>, vector<1x128xf32>
    %7 = vector.broadcast %6 : vector<1x128xf32> to vector<8x128xf32>
    %8 = arith.addf %5, %7 : vector<8x128xf32>
    %c0_6 = arith.constant 0 : index
    %c0_7 = arith.constant 0 : index
    %9 = vector.load %arg7[%c0_6, %c0_7] : memref<8x128xf32, #tpu.memory_space<vmem>>, vector<8x128xf32>
    tpu.vector_store %arg7[%c0_6, %c0_7], %8 {strides = array<i32>} : memref<8x128xf32, #tpu.memory_space<vmem>>, vector<8x128xf32>,
    return
  }
  func.func @transform_0(%arg0: i32, %arg1: i32) -> (i32, i32) {
    %c0_i32 = arith.constant 0 : i32
    %c0_i32_0 = arith.constant 0 : i32
    return %arg0, %c0_i32 : i32, i32
  }
  func.func @transform_1(%arg0: i32, %arg1: i32) -> (i32, i32) {
    %c0_i32 = arith.constant 0 : i32
    %c0_i32_0 = arith.constant 0 : i32
    %c0_i32_1 = arith.constant 0 : i32
    return %c0_i32, %c0_i32_0 : i32, i32
  }
  func.func @transform_2(%arg0: i32, %arg1: i32) -> (i32, i32) {
    %c0_i32 = arith.constant 0 : i32
    %c0_i32_0 = arith.constant 0 : i32
    %c0_i32_1 = arith.constant 0 : i32
    return %c0_i32, %c0_i32_0 : i32, i32
  }
  func.func @transform_3(%arg0: i32, %arg1: i32) -> (i32, i32) {
    %c0_i32 = arith.constant 0 : i32
    %c0_i32_0 = arith.constant 0 : i32
    return %c0_i32, %arg1 : i32, i32
  }
  func.func @transform_4(%arg0: i32, %arg1: i32) -> (i32, i32) {
    %c0_i32 = arith.constant 0 : i32
    %c0_i32_0 = arith.constant 0 : i32
    return %c0_i32, %arg1 : i32, i32
  }
  func.func @transform_5(%arg0: i32, %arg1: i32) -> (i32, i32) {
    %c0_i32 = arith.constant 0 : i32
    return %arg0, %arg1 : i32, i32
  }
}

</mosaic_0001>

<bundles_post_ra>
// kernel: tpu_custom_call.1
= control target key start
LH: loop header
LB: loop body
LE: loop exit
PB: predicated region body
PF: predicated region fallthrough
CT: control target
= control target key end

     0   :  { %10 = vsyncpa [#allocation4], 0  ;;  %s1005_s0 = inlined_call_operand.hbm [shape: f32[16,32], index: 0, kind: input, shape index: {}]   ;;  %s1006_s1 = inlined_call_operand.hbm [shape: f32[1,32], index: 1, kind: input, shape index: {}]   ;;  %s1007_s2 = inlined_call_operand.vmem [shape: f32[1,32], index: 2, kind: input, shape index: {}]   ;;  %s1008_s3 = inlined_call_operand.hbm [shape: f32[32,128], index: 3, kind: input, shape index: {}]   ;;  %s1009_s4 = inlined_call_operand.vmem [shape: f32[1,128], index: 4, kind: input, shape index: {}]   ;;  %s1010_s5 = inlined_call_operand.hbm [shape: f32[16,128], index: 5, kind: output, shape index: {}]  }
   0x1   :  { %12 = vsyncpa [#allocation4 + $0x1], 0 }
   0x2   :  { %13 = vsyncpa [#allocation7], 0 }
   0x3   :  { %14 = vsyncpa [#allocation5], 0 }
   0x4   :  { %16 = vsyncpa [#allocation5 + $0x1], 0  ;;  %s845_s18 = smov 0   ;;  %s847_s19 = smov 0  }
   0x5   :  { %s849_s20 = smov 0   ;;  %s851_s21 = smov 0  }
   0x6   :  { %s853_s22 = smov 0   ;;  %s855_s23 = smov 0  }
   0x7 LB: > { %s520_s24 = sadd.s32 4294967295, %s808_s23   ;;  %s521_s25 = sadd.s32 4294967294, %s808_s23   ;;  %s808_s23 = sphi %s855_s23, %s22_s23   ;;  %s804_s22 = sphi %s853_s22, %s1020_s22   ;;  %s800_s21 = sphi %s851_s21, %s1019_s21   ;;  %s796_s20 = sphi %s849_s20, %s1018_s20   ;;  %s792_s19 = sphi %s847_s19, %s1017_s19   ;;  %s788_s18 = sphi %s845_s18, %s1016_s18  }
   0x8   : > { %p54_p0 = scmp.ne.s32.totalorder %s792_s19, %s788_s18  ;;  %p881_p1 = scmp.eq.s32.totalorder %s520_s24, 0 }
   0x9   : > { %p180_p2 = scmp.eq.s32.totalorder %s521_s25, 1  ;;  %p522_p4 = scmp.ge.s32.totalorder %s808_s23, 1 }
   0xa   : > { %p887_p3 = por %p881_p1, %p54_p0  ;;  %p187_p6 = scmp.lt.s32.totalorder %s808_s23, 3 }
   0xb   : > { %p892_p5 = por %p180_p2, %p54_p0  ;;  %s199_s6 = sshll.u32 %s1006_s1, 4  ;;  %s200_s6 = int_to_ptr.hbm [resolvable:$true] %s199_s6 }
   0xc   : > { %p900_p7 = pnand %p522_p4, %p187_p6  ;;  %p526_p8 = scmp.ge.s32.totalorder %s808_s23, 2 }
   0xd   : > { %s810_s8 = smov [#allocation6]   ;;  %s215_s12 = sshll.u32 %s1008_s3, 4  ;;  %s216_s12 = int_to_ptr.hbm [resolvable:$true] %s215_s12 }
   0xe   : > { %p551_p9 = pneg %p900_p7  ;;  %s201_s9 = sshll.u32 %s810_s8, 4  ;;  %s202_s9 = int_to_ptr.vmem [resolvable:$true] %s201_s9 }
   0xf   : > { %s811_s13 = smov [#allocation8]   ;;  %s812_s15 = smov 128  }
  0x10   : > { %p552_p10 = pnand %p551_p9, %p881_p1  ;;  %s217_s14 = sshll.u32 %s811_s13, 4  ;;  %s218_s14 = int_to_ptr.vmem [resolvable:$true] %s217_s14 }
  0x11   : > { %s813_s16 = smov 8   ;;  %p174_p11 = scmp.eq.s32.totalorder %s520_s24, 1 }
  0x12   : > { %554 = dma.hbm_to_vmem [thread:$0]  (!%p552_p10), %s200_s6, 16, %s202_s9, [#allocation7]  }
  0x13   : > { %557 = dma.hbm_to_vmem [thread:$0]  (!%p552_p10), %s216_s12, 512, %s218_s14, [#allocation7], %s812_s15, %s812_s15, %s813_s16  }
  0x14   : > { %s34_s17 = sadd.s32 1, %s804_s22  ;;  %s41_s25 = sadd.s32 1, %s796_s20 }
  0x15   : > { %p36_p12 = scmp.ge.s32.totalorder %s34_s17, 2  ;;  %p48_p13 = scmp.ne.s32.totalorder %s796_s20, %s792_s19 }
  0x16   : > { %p49_p0 = scmp.eq.s32.totalorder %s808_s23, 0  ;;  %p568_p4 = scmp.lt.s32.totalorder %s808_s23, 2 }
  0x17   : > { %s1022_s17 = smov (%p36_p12, %s34_s17), 0  ;;  %p921_p2 = por %p174_p11, %p48_p13 }
  0x18   : > { %s38_s30 = ssub.s32 %s804_s22, %s1022_s17  ;;  %s237_s6 = sand.u32 1, %s796_s20  }
  0x19   : > { %p39_p6 = scmp.eq.s32.totalorder %s38_s30, 0  ;;  %p50_p9 = por %p49_p0, %p48_p13 }
  0x1a   : > { %s527_s8 = sshll.u32 %s237_s6, 3  ;;  %s528_s24 = sshll.u32 %s804_s22, 3 }
  0x1b   : > { %s931_s9 = scalar_select %p39_p6, %s796_s20, %s41_s25  }
  0x1c   : > { %s245_s12 = scalar_lea.hbm %s1005_s0, %s528_s24  ;;  %s241_s14 = scalar_lea.vmem [#allocation3], %s527_s8 }
  0x1d   : > { %s247_s13 = sshll.u32 %s245_s12, 4  ;;  %s249_s15 = sshll.u32 %s241_s14, 4  ;;  %s248_s13 = int_to_ptr.hbm [resolvable:$true] %s247_s13  ;;  %s250_s15 = int_to_ptr.vmem [resolvable:$true] %s249_s15 }
  0x1e   : > { %p559_p10 = pnand %p568_p4, %p50_p9  ;;  %s238_s16 = scalar_lea.sflag [#allocation4], %s237_s6 }
  0x1f   : > { %258 = sbr.rel (%p900_p7) target bundleno = 336 (0x150), region = 40  ;;  %s941_s25 = sand.u32 (!%p900_p7), 1, %s792_s19  }
  0x20   : > { %561 = dma.hbm_to_vmem [thread:$0]  (!%p559_p10), %s248_s13, 128, %s250_s15, %s238_s16  }
  0x21   : > { %s530_s30 = sshll.u32 (!%p900_p7), %s941_s25, 3  ;;  %s261_s24 = scalar_lea.sflag (!%p900_p7), [#allocation4], %s941_s25 }
  0x22   : > { %s264_s8 = scalar_lea.vmem (!%p900_p7), [#allocation3], %s530_s30 }
  0x24   : > { %775 = dma.done.wait (%p887_p3), %s261_s24, 128  }
  0x25   : > { %777 = vsyncadd (%p887_p3), %s261_s24, 4294967168 }
  0x26   : > { %779 = dma.done.wait (%p881_p1), [#allocation7], 528  }
  0x27   : > { %781 = vsyncadd (%p881_p1), [#allocation7], 4294966768  ;;  %vm313_vm0 = vcmask 261120   ;;  %v312_v0 = vld [vmem:[%s264_s8] sm:$0xff]  ;;  %v814_v4 = vmov 32.0   ;;  %v358_v21 = vld [vmem:[#allocation8] sm:$0xff] }
  0x28   : > { %v314_v1 = vsel %vm313_vm0, %v312_v0, 0.0  ;;  %v325_v2 = vmul.f32 %v312_v0, %v312_v0  ;;  %628 = vrcp.f32 %v814_v4  ;;  %v361_v16 = vld [vmem:[#allocation8 + $0x18] sm:$0xff]  ;;  %v360_v17 = vld [vmem:[#allocation8 + $0x10] sm:$0xff]  ;;  %v359_v19 = vld [vmem:[#allocation8 + $0x8] sm:$0xff]  ;;  %s536_s7 = sshll.u32 %s800_s21, 3  ;;  %s304_s14 = scalar_lea.vmem [#allocation9], %s530_s30 }
  0x29   : > { %315 = vadd.xlane.f32.xlu0 %v314_v1  ;;  %382 = vmatpush.msra.mxu0 %v361_v16  ;;  %v625_v30 = vld [vmem:[#allocation6] ss:$0 sm:$0xff]  ;;  %v626_v32 = vld [vmem:[%s1007_s2] ss:$0 sm:$0xff]  ;;  %s403_s11 = scalar_lea.hbm %s1010_s5, %s536_s7  ;;  %s405_s15 = sshll.u32 %s304_s14, 4  ;;  %s406_s15 = int_to_ptr.vmem [resolvable:$true] %s405_s15 }
  0x2a   : > { %v326_v3 = vsel %vm313_vm0, %v325_v2, 0.0  ;;  %v627_v37 = vld [vmem:[%s1009_s4] ss:$0 sm:$0xff]  ;;  %s407_s16 = sshll.u32 %s403_s11, 4  ;;  %s392_s24 = scalar_lea.sflag [#allocation5], %s941_s25  ;;  %s408_s16 = int_to_ptr.hbm [resolvable:$true] %s407_s16 }
  0x2b   : > { %383 = vmatpush.msra.mxu0 %v360_v17  ;;  %s736_s21 = sshra.s32 %s408_s16, 4  ;;  %s742_s7 = scalar_lea.hbm %s1010_s5, 16  ;;  %s737_s21 = int_to_ptr.hbm [resolvable:$true] %s736_s21 }
  0x2c   : > { %s738_s8 = scalar_lea.hbm %s737_s21, 8  ;;  %p743_p11 = scmp.lt.s32.totalorder %s737_s21, %s1010_s5 }
  0x2d   : > { %384 = vmatpush.msra.mxu0 %v359_v19  ;;  %p739_p1 = scmp.ne.s32.totalorder %s737_s21, %s738_s8  ;;  %p744_p12 = scmp.lt.s32.totalorder %s742_s7, %s738_s8 }
  0x2e   : > { %v629_v5 = vpop.eup %628 }
  0x2f   : > { %v318_v6 = vmul.f32 32.0, %v629_v5  ;;  %vm322_vm1 = vweird.f32 %v629_v5  ;;  %385 = vmatpush.msra.mxu0 %v358_v21  ;;  %p740_p3 = pnand %p739_p1, %p921_p2  ;;  %p745_p13 = por %p744_p12, %p743_p11 }
  0x31   : > { %327 = vadd.xlane.f32.xlu0 %v326_v3  ;;  %v319_v7 = vsub.f32 1.0, %v318_v6  ;;  %p741_p7 = pneg %p740_p3 }
  0x33   : > { %v320_v8 = vmul.f32 %v629_v5, %v319_v7  ;;  %p746_p0 = pnand %p745_p13, %p741_p7 }
  0x35   : > { %v321_v9 = vadd.f32 %v629_v5, %v320_v8 }
  0x37   : > { %v323_v11 = vsel %vm322_vm1, %v629_v5, %v321_v9 }
  0x9c   : > { %v316_v10 = vpop.xlane.xlu0 %315 }
  0x9d   : > { %v324_v12 = vmul.f32 %v323_v11, %v316_v10 }
  0x9f   : > { %v330_v14 = vmul.f32 %v324_v12, %v324_v12  ;;  %v333_v29 = vsub.f32 %v312_v0, %v324_v12 }
  0xa4   : > { %v328_v13 = vpop.xlane.xlu0 %327 }
  0xa5   : > { %v329_v15 = vmul.f32 %v328_v13, %v323_v11 }
  0xa7   : > { %v331_v18 = vsub.f32 %v329_v15, %v330_v14 }
  0xa9   : > { %v332_v20 = vmax.f32 %v331_v18, 0.0 }
  0xab   : > { %v334_v22 = vadd.f32 1e-05, %v332_v20 }
  0xad   : > { %630 = vrsqrt.f32 %v334_v22  ;;  %vm341_vm3 = vweird.f32 %v334_v22 }
  0xb3   : > { %v631_v23 = vpop.eup %630 }
  0xb4   : > { %v336_v24 = vmul.f32 %v631_v23, %v334_v22  ;;  %vm342_vm2 = vweird.f32 %v631_v23 }
  0xb5   : > { %vm343_vm4 = vmor %vm341_vm3, %vm342_vm2 }
  0xb6   : > { %v337_v25 = vmul.f32 %v631_v23, %v336_v24 }
  0xb8   : > { %v338_v26 = vmul.f32 0.5, %v337_v25 }
  0xba   : > { %v339_v27 = vsub.f32 1.5, %v338_v26 }
  0xbc   : > { %v340_v28 = vmul.f32 %v631_v23, %v339_v27 }
  0xbe   : > { %v344_v31 = vsel %vm343_vm4, %v631_v23, %v340_v28 }
  0xbf   : > { %v345_v33 = vmul.f32 %v344_v31, %v333_v29 }
  0xc1   : > { %v350_v34 = vmul.f32 %v625_v30, %v345_v33 }
  0xc3   : > { %v355_v35 = vadd.f32 %v626_v32, %v350_v34 }
  0xc5   : > { %356 = vst.msk [vmem:[#allocation2] sm:$0xff] %vm313_vm0, %v355_v35 }
  0xcc   : > { %v357_v36 = vld [vmem:[#allocation2] sm:$0xff] }
  0xcd   : > { %534 = vmatmul.msk.f32.vlgmr.msra.gmra.mxu0 %vm313_vm0, %v357_v36 }
 0x14a   : > { %v387_v38 = vpop.f32.mrf.mxu0 }
 0x14b   : > { %v388_v39 = vadd.f32 %v627_v37, %v387_v38 }
 0x14d   : > { %390 = vst [vmem:[%s304_s14] sm:$0xff] %v388_v39 }
 0x14e   : > { %749 = shalt.err (!%p746_p0)
}
 0x14f   : > { %549 = dma.vmem_to_hbm [thread:$0]  (%p921_p2), %s406_s15, 128, %s408_s16, %s392_s24  }
 0x150 PF: > { %s419_s25 = sand.u32 1, %s788_s18   ;;  %p563_p4 = pnand %p526_p8, %p892_p5 }
 0x151   : > { %s420_s10 = scalar_lea.sflag [#allocation5], %s419_s25 }
 0x152   : > { %p564_p6 = pneg %p563_p4 }
 0x154   : > { %783 = dma.done.wait (%p564_p6), %s420_s10, 128  }
 0x155   : > { %785 = vsyncadd (%p564_p6), %s420_s10, 4294967168  ;;  %s22_s23 = sadd.s32 1, %s808_s23   ;;  %s1016_s18 = smov %s792_s19 }
 0x156   : > { %p19_p9 = scmp.ge.s32.totalorder %s22_s23, 4   ;;  %s1017_s19 = smov %s796_s20 }
 0x157   : > { %s1018_s20 = smov %s931_s9  ;;  %s1019_s21 = smov %s804_s22 }
 0x158   : > { %s1020_s22 = smov %s1022_s17  ;;  %21 = sbr.rel (!%p19_p9) target bundleno = 7 (0x7), region = 101 }
 0x15d   :  { %426 = vsyncpa [#allocation4], 1 }
 0x15e   :  { %428 = vsyncpa [#allocation4 + $0x1], 1 }
 0x15f   :  { %429 = vsyncpa [#allocation7], 1 }
 0x160   :  { %430 = vsyncpa [#allocation5], 1 }
 0x161   :  { %432 = vsyncpa [#allocation5 + $0x1], 1 }

</bundles_post_ra>
